<compile_context>
chip_gen: v7x
topology: tpu7x:2x2x1
jax: 0.10.0
libtpu: 0.0.40
codegen_flags: <defaults>
</compile_context>

<pallas_src>
import functools
import math

import jax
import jax.numpy as jnp
from jax.experimental import pallas as pl
from jax.experimental.pallas import tpu as pltpu


LANE = 128        # TPU lane width; channel dims are zero-padded to this.
HALO_ROWS = 8     # halo block (deinterleaved rows) fetched past each body tile.
TIME_TILE = 512   # target output rows per time tile for layers >= 1.


def _round_up(x, m):
    return (x + m - 1) // m * m


def _cdiv(a, b):
    return -(-a // b)


def _vmem_limit_bytes():
    # ~3/4 of physical VMEM per generation: 128 MiB parts (v5e/v6e) -> 96 MiB,
    # v7x (64 MiB) -> 48 MiB.  Falls back to 48 MiB if the query is missing.
    try:
        cap = int(pltpu.get_tpu_info().vmem_capacity_bytes)
    except Exception:
        cap = 64 * 1024 * 1024
    return max(32 * 1024 * 1024, min(3 * cap // 4, 100 * 1024 * 1024))


# TODO(synk): torch nn.GELU() defaults to the exact erf form; the tanh
# approximation (max deviation ~1e-3) is used for portable Mosaic lowering.
def _gelu(x):
    c = math.sqrt(2.0 / math.pi)
    return 0.5 * x * (1.0 + jnp.tanh(c * (x + 0.044715 * x * x * x)))


# ---------------------------------------------------------------------------
# Block 0: Conv1d(1, d0, k, s) -> Dropout(0)=id -> Fp32GroupNorm(d0, d0) -> GELU
# Input waveform presented deinterleaved as (rows = L/s, lanes = s); output
# row t needs waveform rows t .. t+n_rows-1, i.e. n_rows contiguous
# sublane-shifted slices -> n_rows small MXU matmuls (no strided gathers,
# no rank-1 lane broadcasts).
# ---------------------------------------------------------------------------
def _conv1d_cin1_gn_gelu_kernel(x_ref, w_ref, g_ref, b_ref, o_ref,
                                *, n_rows, t_out):
    # x_ref: (R, s) f32; w_ref: (n_rows, s, Cp) bf16; g/b_ref: (1, Cp) f32;
    # o_ref: (t_out, Cp) bf16.
    acc = jnp.dot(x_ref[0:t_out, :].astype(jnp.bfloat16), w_ref[0],
                  preferred_element_type=jnp.float32)
    for r in range(1, n_rows):
        acc = acc + jnp.dot(x_ref[r:r + t_out, :].astype(jnp.bfloat16),
                            w_ref[r], preferred_element_type=jnp.float32)
    # Fp32GroupNorm with num_groups == num_channels: per-channel stats over
    # the full time axis, fp32, biased variance, eps=1e-5.  Padded channels
    # have all-zero weights -> acc == 0 -> stay exactly 0 through norm/GELU.
    mean = jnp.mean(acc, axis=0, keepdims=True)
    var = jnp.mean(jnp.square(acc - mean), axis=0, keepdims=True)
    y = (acc - mean) * jax.lax.rsqrt(var + 1e-5)
    y = y * g_ref[...] + b_ref[...]
    o_ref[...] = _gelu(y).astype(o_ref.dtype)


def conv_block_first(xr, w, gamma, beta, *, n_rows, t_out):
    """xr: (B, R, s) f32; w: (n_rows, s, Cp) bf16; gamma/beta: (1, Cp) f32."""
    B, R, s = xr.shape
    cp = w.shape[2]
    kern = functools.partial(_conv1d_cin1_gn_gelu_kernel,
                             n_rows=n_rows, t_out=t_out)
    cost = pl.CostEstimate(
        flops=2 * B * t_out * n_rows * s * cp + 10 * B * t_out * cp,
        transcendentals=B * t_out * cp,
        bytes_accessed=xr.size * 4 + w.size * 2 + 2 * cp * 4
        + B * t_out * cp * 2)
    return pl.pallas_call(
        kern,
        out_shape=jax.ShapeDtypeStruct((B, t_out, cp), jnp.bfloat16),
        grid=(B,),
        in_specs=[pl.BlockSpec((None, R, s), lambda b: (b, 0, 0)),
                  pl.BlockSpec((n_rows, s, cp), lambda b: (0, 0, 0)),
                  pl.BlockSpec((1, cp), lambda b: (0, 0)),
                  pl.BlockSpec((1, cp), lambda b: (0, 0))],
        out_specs=pl.BlockSpec((None, t_out, cp), lambda b: (b, 0, 0)),
        compiler_params=pltpu.CompilerParams(
            dimension_semantics=("parallel",),
            vmem_limit_bytes=_vmem_limit_bytes()),
        cost_estimate=cost,
    )(xr, w, gamma, beta)


# ---------------------------------------------------------------------------
# Blocks >= 1: Conv1d(bias=False) -> Dropout(0)=id -> GELU, halo time-tiled.
# Input is stride-deinterleaved: dei row t = [orig rows t*s .. t*s+s-1, each
# Cin_p lanes].  Output row t = sum_r dei[t+r] @ W_r where W_r holds taps
# [r*s, (r+1)*s) (zero-padded past k).  The body block supplies dei rows
# [t0, t0+tt); the 8-row halo block supplies dei rows [t0+tt, t0+tt+8) needed
# by the last n_rows-1 output rows of the tile.
# ---------------------------------------------------------------------------
def _conv1d_gelu_tiled_kernel(x_body_ref, x_halo_ref, w_ref, o_ref, acc_ref,
                              *, n_rows, tt):
    # x_body_ref: (tt, s*Cin_p) bf16; x_halo_ref: (8, s*Cin_p) bf16;
    # w_ref: (n_rows, s*Cin_p, Cout_p) bf16; o_ref: (tt, Cout_p) bf16;
    # acc_ref: (tt, Cout_p) f32 scratch.
    first = jnp.dot(x_body_ref[...], w_ref[0],
                    preferred_element_type=jnp.float32)
    if n_rows == 1:
        o_ref[...] = _gelu(first).astype(o_ref.dtype)
        return
    acc_ref[...] = first
    for r in range(1, n_rows):
        acc_ref[0:tt - r, :] += jnp.dot(x_body_ref[r:tt, :], w_ref[r],
                                        preferred_element_type=jnp.float32)
        acc_ref[tt - r:tt, :] += jnp.dot(x_halo_ref[0:r, :], w_ref[r],
                                         preferred_element_type=jnp.float32)
    o_ref[...] = _gelu(acc_ref[...]).astype(o_ref.dtype)


def conv_block_rest(x_dei, w, *, n_rows, t_out_pad, tt):
    """x_dei: (B, R, s*Cin_p) bf16 with R = t_out_pad + 8;
    w: (n_rows, s*Cin_p, Cout_p) bf16."""
    B, R, W = x_dei.shape
    cout_p = w.shape[2]
    nt = t_out_pad // tt
    hb = tt // 8  # halo block (8 rows) index for time tile t is (t+1)*hb
    kern = functools.partial(_conv1d_gelu_tiled_kernel, n_rows=n_rows, tt=tt)
    cost = pl.CostEstimate(
        flops=2 * B * t_out_pad * n_rows * W * cout_p,
        transcendentals=B * t_out_pad * cout_p,
        bytes_accessed=x_dei.size * 2 + w.size * 2 + B * t_out_pad * cout_p * 2)
    return pl.pallas_call(
        kern,
        out_shape=jax.ShapeDtypeStruct((B, t_out_pad, cout_p), jnp.bfloat16),
        grid=(B, nt),
        in_specs=[
            pl.BlockSpec((None, tt, W), lambda b, t: (b, t, 0)),
            pl.BlockSpec((None, HALO_ROWS, W),
                         lambda b, t: (b, (t + 1) * hb, 0)),
            pl.BlockSpec((n_rows, W, cout_p), lambda b, t: (0, 0, 0)),
        ],
        out_specs=pl.BlockSpec((None, tt, cout_p), lambda b, t: (b, t, 0)),
        scratch_shapes=[pltpu.VMEM((tt, cout_p), jnp.float32)],
        compiler_params=pltpu.CompilerParams(
            dimension_semantics=("parallel", "parallel"),
            vmem_limit_bytes=_vmem_limit_bytes()),
        cost_estimate=cost,
    )(x_dei, x_dei, w)


# ---------------------------------------------------------------------------
# Full forward pass
# ---------------------------------------------------------------------------
def conv_feature_extraction_forward(x, params, conv_layers, tile_rows=TIME_TILE):
    """x: (B, T) raw waveform.  Returns (B, C_last, T_final) like PyTorch."""
    B, L = x.shape
    x = x.astype(jnp.float32)

    # ---- Block 0: conv -> GroupNorm -> GELU (mode='default', i == 0) ----
    dim, k, s = conv_layers[0]
    n_rows = (k - 1) // s + 1
    t_out = (L - k) // s + 1
    rows0 = max(_cdiv(L, s), t_out + n_rows - 1)
    xr = jnp.pad(x, ((0, 0), (0, rows0 * s - L))).reshape(B, rows0, s)
    cp = _round_up(dim, LANE)
    wk = jnp.transpose(params["conv0_w"][:, 0, :], (1, 0))          # (k, d0)
    wk = jnp.pad(wk, ((0, n_rows * s - k), (0, cp - dim)))
    wk = wk.reshape(n_rows, s, cp).astype(jnp.bfloat16)
    gamma = jnp.pad(params["gn0_gamma"], (0, cp - dim),
                    constant_values=1.0).reshape(1, cp).astype(jnp.float32)
    beta = jnp.pad(params["gn0_beta"],
                   (0, cp - dim)).reshape(1, cp).astype(jnp.float32)
    h = conv_block_first(xr, wk, gamma, beta, n_rows=n_rows, t_out=t_out)
    in_dim, in_pad = dim, cp

    # ---- Blocks >= 1: conv -> GELU ----
    for i, (dim, k, s) in enumerate(conv_layers[1:], start=1):
        n_rows = (k - 1) // s + 1
        assert n_rows - 1 <= HALO_ROWS, "kernel too wide for the 8-row halo"
        t_out = (t_out - k) // s + 1
        assert t_out >= 1, "input too short for this conv stack"
        nt = _cdiv(t_out, tile_rows)
        tt = _round_up(_cdiv(t_out, nt), 8)
        nt = _cdiv(t_out, tt)
        t_out_pad = nt * tt
        r_in = t_out_pad + HALO_ROWS        # deinterleaved rows incl. last halo
        t_need = r_in * s
        t_store = h.shape[1]
        if t_store < t_need:
            # Zero-pad time: padded rows / extra taps hit zero weights or only
            # feed padded (later discarded) output rows -> valid rows exact.
            h = jnp.pad(h, ((0, 0), (0, t_need - t_store), (0, 0)))
        elif t_store > t_need:
            h = h[:, :t_need, :]
        # Free row-major regroup: (T, Cin_p) -> (T/s, s*Cin_p); every tap now
        # lives at a fixed lane group and a sublane offset in 0..n_rows-1.
        x_dei = h.reshape(B, r_in, s * in_pad)

        cop = _round_up(dim, LANE)
        w = jnp.transpose(params[f"conv{i}_w"], (2, 1, 0))           # (k, Ci, Co)
        w = jnp.pad(w, ((0, n_rows * s - k), (0, in_pad - in_dim),
                        (0, cop - dim)))
        w = w.reshape(n_rows, s * in_pad, cop).astype(jnp.bfloat16)
        h = conv_block_rest(x_dei, w, n_rows=n_rows,
                            t_out_pad=t_out_pad, tt=tt)
        in_dim, in_pad = dim, cop
        # Dropout(p=0.0) is the identity.

    # Drop channel/time padding, back to PyTorch NCL layout, f32.
    h = h[:, :t_out, :in_dim].astype(jnp.float32)
    return jnp.transpose(h, (0, 2, 1))


# ---------------------------------------------------------------------------
# Pure-JAX reference (same tanh-GELU) + synthetic params + demo
# ---------------------------------------------------------------------------
def _reference_forward(x, params, conv_layers):
    h = x[:, None, :].astype(jnp.float32)                 # (B, 1, T) NCL
    for i, (dim, k, s) in enumerate(conv_layers):
        w = params[f"conv{i}_w"].astype(jnp.float32)      # (Cout, Cin, k)
        h = jax.lax.conv_general_dilated(
            h, w, window_strides=(s,), padding="VALID",
            dimension_numbers=("NCH", "OIH", "NCH"))
        if i == 0:                                        # Fp32GroupNorm(d0, d0)
            mean = jnp.mean(h, axis=2, keepdims=True)
            var = jnp.mean(jnp.square(h - mean), axis=2, keepdims=True)
            h = (h - mean) * jax.lax.rsqrt(var + 1e-5)
            h = (h * params["gn0_gamma"][None, :, None]
                 + params["gn0_beta"][None, :, None])
        h = _gelu(h)
    return h


def make_params(conv_layers, key):
    """Deterministic synthetic init matching the module's __init__ shapes."""
    params = {}
    in_d = 1
    for i, (dim, k, _s) in enumerate(conv_layers):
        key, sub = jax.random.split(key)
        std = math.sqrt(2.0 / (in_d * k))   # kaiming_normal_, fan_in, relu gain
        params[f"conv{i}_w"] = std * jax.random.normal(
            sub, (dim, in_d, k), dtype=jnp.float32)
        in_d = dim
    dim0 = conv_layers[0][0]
    params["gn0_gamma"] = jnp.ones((dim0,), jnp.float32)
    params["gn0_beta"] = jnp.zeros((dim0,), jnp.float32)
    return params


if __name__ == "__main__":
    # Small config consistent with the module: mode='default', conv_bias=False,
    # dropout=0.0, conv_layers = [(dim, k, stride), ...].
    conv_layers = [(32, 10, 5), (32, 3, 2), (32, 2, 2)]
    B, L = 2, 160

    key = jax.random.PRNGKey(0)
    key, kx = jax.random.split(key)
    x = jax.random.normal(kx, (B, L), dtype=jnp.float32)
    params = make_params(conv_layers, key)

    fwd = jax.jit(
        lambda xx, pp: conv_feature_extraction_forward(xx, pp, conv_layers))
    out = jax.block_until_ready(fwd(x, params))

    # Expected time lengths: 160 -> 31 -> 15 -> 7.
    assert out.shape == (B, conv_layers[-1][0], 7), out.shape
    assert bool(jnp.all(jnp.isfinite(out)))

    # Coarse numerical sanity check against a pure-JAX f32 reference (kernel
    # path uses bf16 weights/activations -> generous, non-flaky tolerance).
    ref = _reference_forward(x, params, conv_layers)
    max_err = float(jnp.max(jnp.abs(out - ref)))
    assert max_err < 0.25, f"max abs error vs reference: {max_err}"

    print("KERNEL_OK")
</pallas_src>

<mosaic_0001>
module attributes {stable_mosaic.version = 11 : i64} {
  func.func @_conv1d_cin1_gn_gelu_kernel(%arg0: i32, %arg1: memref<1x32x5xf32, #tpu.memory_space<vmem>>, %arg2: memref<2x5x128xbf16, #tpu.memory_space<vmem>>, %arg3: memref<1x128xf32, #tpu.memory_space<vmem>>, %arg4: memref<1x128xf32, #tpu.memory_space<vmem>>, %arg5: memref<1x31x128xbf16, #tpu.memory_space<vmem>>) attributes {dimension_semantics = [#tpu.dimension_semantics<parallel>], iteration_bounds = array<i64: 2>, scalar_prefetch = 0 : i64, scratch_operands = 0 : i64, tpu.core_type = #tpu.core_type<tc>, window_params = [{transform_indices = @transform_0, window_bounds = array<i64: 1, 32, 5>}, {pipeline_mode = #tpu.pipeline_mode<synchronous>, transform_indices = @transform_1, window_bounds = array<i64: 2, 5, 128>}, {pipeline_mode = #tpu.pipeline_mode<synchronous>, transform_indices = @transform_2, window_bounds = array<i64: 1, 128>}, {pipeline_mode = #tpu.pipeline_mode<synchronous>, transform_indices = @transform_3, window_bounds = array<i64: 1, 128>}, {transform_indices = @transform_4, window_bounds = array<i64: 1, 31, 128>}]} {
    %c0 = arith.constant 0 : index
    %c0_0 = arith.constant 0 : index
    %c0_1 = arith.constant 0 : index
    %0 = vector.load %arg1[%c0, %c0_0, %c0_1] : memref<1x32x5xf32, #tpu.memory_space<vmem>>, vector<1x31x5xf32>
    %1 = vector.shape_cast %0 : vector<1x31x5xf32> to vector<31x5xf32>
    %2 = arith.truncf %1 : vector<31x5xf32> to vector<31x5xbf16>
    %c0_2 = arith.constant 0 : index
    %c0_3 = arith.constant 0 : index
    %c0_4 = arith.constant 0 : index
    %3 = vector.load %arg2[%c0_2, %c0_3, %c0_4] : memref<2x5x128xbf16, #tpu.memory_space<vmem>>, vector<1x5x128xbf16>
    %4 = vector.shape_cast %3 : vector<1x5x128xbf16> to vector<5x128xbf16>
    %cst = arith.constant dense<0.000000e+00> : vector<31x128xf32>
    %5 = tpu.matmul %2, %4, %cst {dimension_numbers = #tpu.dot_dimension_numbers<[1], [0], [0], [1], [0, 0, 1, 1], [], []>} : vector<31x5xbf16>, vector<5x128xbf16>, vector<31x128xf32> -> vector<31x128xf32>
    %c0_5 = arith.constant 0 : index
    %c1 = arith.constant 1 : index
    %c0_6 = arith.constant 0 : index
    %6 = vector.load %arg1[%c0_5, %c1, %c0_6] : memref<1x32x5xf32, #tpu.memory_space<vmem>>, vector<1x31x5xf32>
    %7 = vector.shape_cast %6 : vector<1x31x5xf32> to vector<31x5xf32>
    %8 = arith.truncf %7 : vector<31x5xf32> to vector<31x5xbf16>
    %c1_7 = arith.constant 1 : index
    %c0_8 = arith.constant 0 : index
    %c0_9 = arith.constant 0 : index
    %9 = vector.load %arg2[%c1_7, %c0_8, %c0_9] : memref<2x5x128xbf16, #tpu.memory_space<vmem>>, vector<1x5x128xbf16>
    %10 = vector.shape_cast %9 : vector<1x5x128xbf16> to vector<5x128xbf16>
    %cst_10 = arith.constant dense<0.000000e+00> : vector<31x128xf32>
    %11 = tpu.matmul %8, %10, %cst_10 {dimension_numbers = #tpu.dot_dimension_numbers<[1], [0], [0], [1], [0, 0, 1, 1], [], []>} : vector<31x5xbf16>, vector<5x128xbf16>, vector<31x128xf32> -> vector<31x128xf32>
    %12 = arith.addf %5, %11 : vector<31x128xf32>
    %cst_11 = arith.constant dense<0.000000e+00> : vector<128xf32>
    %13 = vector.multi_reduction <add>, %12, %cst_11 [0] : vector<31x128xf32> to vector<128xf32>
    %14 = vector.shape_cast %13 : vector<128xf32> to vector<1x128xf32>
    %cst_12 = arith.constant 3.100000e+01 : f32
    %15 = vector.broadcast %cst_12 : f32 to vector<1x128xf32>
    %16 = arith.divf %14, %15 : vector<1x128xf32>
    %17 = vector.broadcast %16 : vector<1x128xf32> to vector<31x128xf32>
    %18 = arith.subf %12, %17 : vector<31x128xf32>
    %19 = arith.mulf %18, %18 : vector<31x128xf32>
    %cst_13 = arith.constant dense<0.000000e+00> : vector<128xf32>
    %20 = vector.multi_reduction <add>, %19, %cst_13 [0] : vector<31x128xf32> to vector<128xf32>
    %21 = vector.shape_cast %20 : vector<128xf32> to vector<1x128xf32>
    %cst_14 = arith.constant 3.100000e+01 : f32
    %22 = vector.broadcast %cst_14 : f32 to vector<1x128xf32>
    %23 = arith.divf %21, %22 : vector<1x128xf32>
    %24 = vector.broadcast %16 : vector<1x128xf32> to vector<31x128xf32>
    %25 = arith.subf %12, %24 : vector<31x128xf32>
    %cst_15 = arith.constant 9.99999974E-6 : f32
    %26 = vector.broadcast %cst_15 : f32 to vector<1x128xf32>
    %27 = arith.addf %23, %26 : vector<1x128xf32>
    %28 = math.rsqrt %27 : vector<1x128xf32>
    %29 = vector.broadcast %28 : vector<1x128xf32> to vector<31x128xf32>
    %30 = arith.mulf %25, %29 : vector<31x128xf32>
    %c0_16 = arith.constant 0 : index
    %c0_17 = arith.constant 0 : index
    %31 = vector.load %arg3[%c0_16, %c0_17] : memref<1x128xf32, #tpu.memory_space<vmem>>, vector<1x128xf32>
    %32 = vector.broadcast %31 : vector<1x128xf32> to vector<31x128xf32>
    %33 = arith.mulf %30, %32 : vector<31x128xf32>
    %c0_18 = arith.constant 0 : index
    %c0_19 = arith.constant 0 : index
    %34 = vector.load %arg4[%c0_18, %c0_19] : memref<1x128xf32, #tpu.memory_space<vmem>>, vector<1x128xf32>
    %35 = vector.broadcast %34 : vector<1x128xf32> to vector<31x128xf32>
    %36 = arith.addf %33, %35 : vector<31x128xf32>
    %cst_20 = arith.constant 5.000000e-01 : f32
    %37 = vector.broadcast %cst_20 : f32 to vector<31x128xf32>
    %38 = arith.mulf %37, %36 : vector<31x128xf32>
    %cst_21 = arith.constant 4.471500e-02 : f32
    %39 = vector.broadcast %cst_21 : f32 to vector<31x128xf32>
    %40 = arith.mulf %39, %36 : vector<31x128xf32>
    %41 = arith.mulf %40, %36 : vector<31x128xf32>
    %42 = arith.mulf %41, %36 : vector<31x128xf32>
    %43 = arith.addf %36, %42 : vector<31x128xf32>
    %cst_22 = arith.constant 0.797884583 : f32
    %44 = vector.broadcast %cst_22 : f32 to vector<31x128xf32>
    %45 = arith.mulf %44, %43 : vector<31x128xf32>
    %46 = math.tanh %45 : vector<31x128xf32>
    %cst_23 = arith.constant 1.000000e+00 : f32
    %47 = vector.broadcast %cst_23 : f32 to vector<31x128xf32>
    %48 = arith.addf %47, %46 : vector<31x128xf32>
    %49 = arith.mulf %38, %48 : vector<31x128xf32>
    %50 = arith.truncf %49 : vector<31x128xf32> to vector<31x128xbf16>
    %c0_24 = arith.constant 0 : index
    %c0_25 = arith.constant 0 : index
    %c0_26 = arith.constant 0 : index
    %51 = vector.load %arg5[%c0_24, %c0_25, %c0_26] : memref<1x31x128xbf16, #tpu.memory_space<vmem>>, vector<1x31x128xbf16>
    %52 = vector.shape_cast %51 : vector<1x31x128xbf16> to vector<31x128xbf16>
    %53 = vector.shape_cast %50 : vector<31x128xbf16> to vector<1x31x128xbf16>
    tpu.vector_store %arg5[%c0_24, %c0_25, %c0_26], %53 {strides = array<i32>} : memref<1x31x128xbf16, #tpu.memory_space<vmem>>, vector<1x31x128xbf16>,
    return
  }
  func.func @transform_0(%arg0: i32) -> (i32, i32, i32) {
    %c0_i32 = arith.constant 0 : i32
    %c0_i32_0 = arith.constant 0 : i32
    %c0_i32_1 = arith.constant 0 : i32
    return %arg0, %c0_i32, %c0_i32_0 : i32, i32, i32
  }
  func.func @transform_1(%arg0: i32) -> (i32, i32, i32) {
    %c0_i32 = arith.constant 0 : i32
    %c0_i32_0 = arith.constant 0 : i32
    %c0_i32_1 = arith.constant 0 : i32
    %c0_i32_2 = arith.constant 0 : i32
    return %c0_i32, %c0_i32_0, %c0_i32_1 : i32, i32, i32
  }
  func.func @transform_2(%arg0: i32) -> (i32, i32) {
    %c0_i32 = arith.constant 0 : i32
    %c0_i32_0 = arith.constant 0 : i32
    %c0_i32_1 = arith.constant 0 : i32
    return %c0_i32, %c0_i32_0 : i32, i32
  }
  func.func @transform_3(%arg0: i32) -> (i32, i32) {
    %c0_i32 = arith.constant 0 : i32
    %c0_i32_0 = arith.constant 0 : i32
    %c0_i32_1 = arith.constant 0 : i32
    return %c0_i32, %c0_i32_0 : i32, i32
  }
  func.func @transform_4(%arg0: i32) -> (i32, i32, i32) {
    %c0_i32 = arith.constant 0 : i32
    %c0_i32_0 = arith.constant 0 : i32
    %c0_i32_1 = arith.constant 0 : i32
    return %arg0, %c0_i32, %c0_i32_0 : i32, i32, i32
  }
}

module attributes {stable_mosaic.version = 11 : i64} {
  func.func @_conv1d_gelu_tiled_kernel(%arg0: i32, %arg1: i32, %arg2: memref<1x16x256xbf16, #tpu.memory_space<vmem>>, %arg3: memref<1x8x256xbf16, #tpu.memory_space<vmem>>, %arg4: memref<2x256x128xbf16, #tpu.memory_space<vmem>>, %arg5: memref<1x16x128xbf16, #tpu.memory_space<vmem>>, %arg6: memref<16x128xf32, #tpu.memory_space<vmem>>) attributes {dimension_semantics = [#tpu.dimension_semantics<parallel>, #tpu.dimension_semantics<parallel>], iteration_bounds = array<i64: 2, 1>, scalar_prefetch = 0 : i64, scratch_operands = 1 : i64, tpu.core_type = #tpu.core_type<tc>, window_params = [{transform_indices = @transform_0, window_bounds = array<i64: 1, 16, 256>}, {transform_indices = @transform_1, window_bounds = array<i64: 1, 8, 256>}, {pipeline_mode = #tpu.pipeline_mode<synchronous>, transform_indices = @transform_2, window_bounds = array<i64: 2, 256, 128>}, {transform_indices = @transform_3, window_bounds = array<i64: 1, 16, 128>}]} {
    %c0 = arith.constant 0 : index
    %c0_0 = arith.constant 0 : index
    %c0_1 = arith.constant 0 : index
    %0 = vector.load %arg2[%c0, %c0_0, %c0_1] : memref<1x16x256xbf16, #tpu.memory_space<vmem>>, vector<1x16x256xbf16>
    %1 = vector.shape_cast %0 : vector<1x16x256xbf16> to vector<16x256xbf16>
    %c0_2 = arith.constant 0 : index
    %c0_3 = arith.constant 0 : index
    %c0_4 = arith.constant 0 : index
    %2 = vector.load %arg4[%c0_2, %c0_3, %c0_4] : memref<2x256x128xbf16, #tpu.memory_space<vmem>>, vector<1x256x128xbf16>
    %3 = vector.shape_cast %2 : vector<1x256x128xbf16> to vector<256x128xbf16>
    %cst = arith.constant dense<0.000000e+00> : vector<16x128xf32>
    %4 = tpu.matmul %1, %3, %cst {dimension_numbers = #tpu.dot_dimension_numbers<[1], [0], [0], [1], [0, 0, 1, 1], [], []>} : vector<16x256xbf16>, vector<256x128xbf16>, vector<16x128xf32> -> vector<16x128xf32>
    %c0_5 = arith.constant 0 : index
    %c0_6 = arith.constant 0 : index
    %5 = vector.load %arg6[%c0_5, %c0_6] : memref<16x128xf32, #tpu.memory_space<vmem>>, vector<16x128xf32>
    tpu.vector_store %arg6[%c0_5, %c0_6], %4 {strides = array<i32>} : memref<16x128xf32, #tpu.memory_space<vmem>>, vector<16x128xf32>,
    %c0_7 = arith.constant 0 : index
    %c0_8 = arith.constant 0 : index
    %6 = vector.load %arg6[%c0_7, %c0_8] : memref<16x128xf32, #tpu.memory_space<vmem>>, vector<15x128xf32>
    %c0_9 = arith.constant 0 : index
    %c1 = arith.constant 1 : index
    %c0_10 = arith.constant 0 : index
    %7 = vector.load %arg2[%c0_9, %c1, %c0_10] : memref<1x16x256xbf16, #tpu.memory_space<vmem>>, vector<1x15x256xbf16>
    %8 = vector.shape_cast %7 : vector<1x15x256xbf16> to vector<15x256xbf16>
    %c1_11 = arith.constant 1 : index
    %c0_12 = arith.constant 0 : index
    %c0_13 = arith.constant 0 : index
    %9 = vector.load %arg4[%c1_11, %c0_12, %c0_13] : memref<2x256x128xbf16, #tpu.memory_space<vmem>>, vector<1x256x128xbf16>
    %10 = vector.shape_cast %9 : vector<1x256x128xbf16> to vector<256x128xbf16>
    %cst_14 = arith.constant dense<0.000000e+00> : vector<15x128xf32>
    %11 = tpu.matmul %8, %10, %cst_14 {dimension_numbers = #tpu.dot_dimension_numbers<[1], [0], [0], [1], [0, 0, 1, 1], [], []>} : vector<15x256xbf16>, vector<256x128xbf16>, vector<15x128xf32> -> vector<15x128xf32>
    %12 = arith.addf %6, %11 : vector<15x128xf32>
    %c0_15 = arith.constant 0 : index
    %c0_16 = arith.constant 0 : index
    %13 = vector.load %arg6[%c0_15, %c0_16] : memref<16x128xf32, #tpu.memory_space<vmem>>, vector<15x128xf32>
    tpu.vector_store %arg6[%c0_15, %c0_16], %12 {strides = array<i32>} : memref<16x128xf32, #tpu.memory_space<vmem>>, vector<15x128xf32>,
    %c15 = arith.constant 15 : index
    %c0_17 = arith.constant 0 : index
    %14 = vector.load %arg6[%c15, %c0_17] : memref<16x128xf32, #tpu.memory_space<vmem>>, vector<1x128xf32>
    %c0_18 = arith.constant 0 : index
    %c0_19 = arith.constant 0 : index
    %c0_20 = arith.constant 0 : index
    %15 = vector.load %arg3[%c0_18, %c0_19, %c0_20] : memref<1x8x256xbf16, #tpu.memory_space<vmem>>, vector<1x1x256xbf16>
    %16 = vector.shape_cast %15 : vector<1x1x256xbf16> to vector<1x256xbf16>
    %c1_21 = arith.constant 1 : index
    %c0_22 = arith.constant 0 : index
    %c0_23 = arith.constant 0 : index
    %17 = vector.load %arg4[%c1_21, %c0_22, %c0_23] : memref<2x256x128xbf16, #tpu.memory_space<vmem>>, vector<1x256x128xbf16>
    %18 = vector.shape_cast %17 : vector<1x256x128xbf16> to vector<256x128xbf16>
    %cst_24 = arith.constant dense<0.000000e+00> : vector<1x128xf32>
    %19 = tpu.matmul %16, %18, %cst_24 {dimension_numbers = #tpu.dot_dimension_numbers<[1], [0], [0], [1], [0, 0, 1, 1], [], []>} : vector<1x256xbf16>, vector<256x128xbf16>, vector<1x128xf32> -> vector<1x128xf32>
    %20 = arith.addf %14, %19 : vector<1x128xf32>
    %c15_25 = arith.constant 15 : index
    %c0_26 = arith.constant 0 : index
    %21 = vector.load %arg6[%c15_25, %c0_26] : memref<16x128xf32, #tpu.memory_space<vmem>>, vector<1x128xf32>
    tpu.vector_store %arg6[%c15_25, %c0_26], %20 {strides = array<i32>} : memref<16x128xf32, #tpu.memory_space<vmem>>, vector<1x128xf32>,
    %c0_27 = arith.constant 0 : index
    %c0_28 = arith.constant 0 : index
    %22 = vector.load %arg6[%c0_27, %c0_28] : memref<16x128xf32, #tpu.memory_space<vmem>>, vector<16x128xf32>
    %cst_29 = arith.constant 5.000000e-01 : f32
    %23 = vector.broadcast %cst_29 : f32 to vector<16x128xf32>
    %24 = arith.mulf %23, %22 : vector<16x128xf32>
    %cst_30 = arith.constant 4.471500e-02 : f32
    %25 = vector.broadcast %cst_30 : f32 to vector<16x128xf32>
    %26 = arith.mulf %25, %22 : vector<16x128xf32>
    %27 = arith.mulf %26, %22 : vector<16x128xf32>
    %28 = arith.mulf %27, %22 : vector<16x128xf32>
    %29 = arith.addf %22, %28 : vector<16x128xf32>
    %cst_31 = arith.constant 0.797884583 : f32
    %30 = vector.broadcast %cst_31 : f32 to vector<16x128xf32>
    %31 = arith.mulf %30, %29 : vector<16x128xf32>
    %32 = math.tanh %31 : vector<16x128xf32>
    %cst_32 = arith.constant 1.000000e+00 : f32
    %33 = vector.broadcast %cst_32 : f32 to vector<16x128xf32>
    %34 = arith.addf %33, %32 : vector<16x128xf32>
    %35 = arith.mulf %24, %34 : vector<16x128xf32>
    %36 = arith.truncf %35 : vector<16x128xf32> to vector<16x128xbf16>
    %c0_33 = arith.constant 0 : index
    %c0_34 = arith.constant 0 : index
    %c0_35 = arith.constant 0 : index
    %37 = vector.load %arg5[%c0_33, %c0_34, %c0_35] : memref<1x16x128xbf16, #tpu.memory_space<vmem>>, vector<1x16x128xbf16>
    %38 = vector.shape_cast %37 : vector<1x16x128xbf16> to vector<16x128xbf16>
    %39 = vector.shape_cast %36 : vector<16x128xbf16> to vector<1x16x128xbf16>
    tpu.vector_store %arg5[%c0_33, %c0_34, %c0_35], %39 {strides = array<i32>} : memref<1x16x128xbf16, #tpu.memory_space<vmem>>, vector<1x16x128xbf16>,
    return
  }
  func.func @transform_0(%arg0: i32, %arg1: i32) -> (i32, i32, i32) {
    %c0_i32 = arith.constant 0 : i32
    %c0_i32_0 = arith.constant 0 : i32
    return %arg0, %arg1, %c0_i32 : i32, i32, i32
  }
  func.func @transform_1(%arg0: i32, %arg1: i32) -> (i32, i32, i32) {
    %c1_i32 = arith.constant 1 : i32
    %0 = arith.addi %arg1, %c1_i32 : i32
    %c2_i32 = arith.constant 2 : i32
    %1 = arith.muli %0, %c2_i32 : i32
    %c0_i32 = arith.constant 0 : i32
    %c0_i32_0 = arith.constant 0 : i32
    return %arg0, %1, %c0_i32 : i32, i32, i32
  }
  func.func @transform_2(%arg0: i32, %arg1: i32) -> (i32, i32, i32) {
    %c0_i32 = arith.constant 0 : i32
    %c0_i32_0 = arith.constant 0 : i32
    %c0_i32_1 = arith.constant 0 : i32
    %c0_i32_2 = arith.constant 0 : i32
    return %c0_i32, %c0_i32_0, %c0_i32_1 : i32, i32, i32
  }
  func.func @transform_3(%arg0: i32, %arg1: i32) -> (i32, i32, i32) {
    %c0_i32 = arith.constant 0 : i32
    %c0_i32_0 = arith.constant 0 : i32
    return %arg0, %arg1, %c0_i32 : i32, i32, i32
  }
}

module attributes {stable_mosaic.version = 11 : i64} {
  func.func @_conv1d_gelu_tiled_kernel(%arg0: i32, %arg1: i32, %arg2: memref<1x8x256xbf16, #tpu.memory_space<vmem>>, %arg3: memref<1x8x256xbf16, #tpu.memory_space<vmem>>, %arg4: memref<1x256x128xbf16, #tpu.memory_space<vmem>>, %arg5: memref<1x8x128xbf16, #tpu.memory_space<vmem>>, %arg6: memref<8x128xf32, #tpu.memory_space<vmem>>) attributes {dimension_semantics = [#tpu.dimension_semantics<parallel>, #tpu.dimension_semantics<parallel>], iteration_bounds = array<i64: 2, 1>, scalar_prefetch = 0 : i64, scratch_operands = 1 : i64, tpu.core_type = #tpu.core_type<tc>, window_params = [{transform_indices = @transform_0, window_bounds = array<i64: 1, 8, 256>}, {transform_indices = @transform_1, window_bounds = array<i64: 1, 8, 256>}, {pipeline_mode = #tpu.pipeline_mode<synchronous>, transform_indices = @transform_2, window_bounds = array<i64: 1, 256, 128>}, {transform_indices = @transform_3, window_bounds = array<i64: 1, 8, 128>}]} {
    %c0 = arith.constant 0 : index
    %c0_0 = arith.constant 0 : index
    %c0_1 = arith.constant 0 : index
    %0 = vector.load %arg2[%c0, %c0_0, %c0_1] : memref<1x8x256xbf16, #tpu.memory_space<vmem>>, vector<1x8x256xbf16>
    %1 = vector.shape_cast %0 : vector<1x8x256xbf16> to vector<8x256xbf16>
    %c0_2 = arith.constant 0 : index
    %c0_3 = arith.constant 0 : index
    %c0_4 = arith.constant 0 : index
    %2 = vector.load %arg4[%c0_2, %c0_3, %c0_4] : memref<1x256x128xbf16, #tpu.memory_space<vmem>>, vector<1x256x128xbf16>
    %3 = vector.shape_cast %2 : vector<1x256x128xbf16> to vector<256x128xbf16>
    %cst = arith.constant dense<0.000000e+00> : vector<8x128xf32>
    %4 = tpu.matmul %1, %3, %cst {dimension_numbers = #tpu.dot_dimension_numbers<[1], [0], [0], [1], [0, 0, 1, 1], [], []>} : vector<8x256xbf16>, vector<256x128xbf16>, vector<8x128xf32> -> vector<8x128xf32>
    %cst_5 = arith.constant 5.000000e-01 : f32
    %5 = vector.broadcast %cst_5 : f32 to vector<8x128xf32>
    %6 = arith.mulf %5, %4 : vector<8x128xf32>
    %cst_6 = arith.constant 4.471500e-02 : f32
    %7 = vector.broadcast %cst_6 : f32 to vector<8x128xf32>
    %8 = arith.mulf %7, %4 : vector<8x128xf32>
    %9 = arith.mulf %8, %4 : vector<8x128xf32>
    %10 = arith.mulf %9, %4 : vector<8x128xf32>
    %11 = arith.addf %4, %10 : vector<8x128xf32>
    %cst_7 = arith.constant 0.797884583 : f32
    %12 = vector.broadcast %cst_7 : f32 to vector<8x128xf32>
    %13 = arith.mulf %12, %11 : vector<8x128xf32>
    %14 = math.tanh %13 : vector<8x128xf32>
    %cst_8 = arith.constant 1.000000e+00 : f32
    %15 = vector.broadcast %cst_8 : f32 to vector<8x128xf32>
    %16 = arith.addf %15, %14 : vector<8x128xf32>
    %17 = arith.mulf %6, %16 : vector<8x128xf32>
    %18 = arith.truncf %17 : vector<8x128xf32> to vector<8x128xbf16>
    %c0_9 = arith.constant 0 : index
    %c0_10 = arith.constant 0 : index
    %c0_11 = arith.constant 0 : index
    %19 = vector.load %arg5[%c0_9, %c0_10, %c0_11] : memref<1x8x128xbf16, #tpu.memory_space<vmem>>, vector<1x8x128xbf16>
    %20 = vector.shape_cast %19 : vector<1x8x128xbf16> to vector<8x128xbf16>
    %21 = vector.shape_cast %18 : vector<8x128xbf16> to vector<1x8x128xbf16>
    tpu.vector_store %arg5[%c0_9, %c0_10, %c0_11], %21 {strides = array<i32>} : memref<1x8x128xbf16, #tpu.memory_space<vmem>>, vector<1x8x128xbf16>,
    return
  }
  func.func @transform_0(%arg0: i32, %arg1: i32) -> (i32, i32, i32) {
    %c0_i32 = arith.constant 0 : i32
    %c0_i32_0 = arith.constant 0 : i32
    return %arg0, %arg1, %c0_i32 : i32, i32, i32
  }
  func.func @transform_1(%arg0: i32, %arg1: i32) -> (i32, i32, i32) {
    %c1_i32 = arith.constant 1 : i32
    %0 = arith.addi %arg1, %c1_i32 : i32
    %c1_i32_0 = arith.constant 1 : i32
    %1 = arith.muli %0, %c1_i32_0 : i32
    %c0_i32 = arith.constant 0 : i32
    %c0_i32_1 = arith.constant 0 : i32
    return %arg0, %1, %c0_i32 : i32, i32, i32
  }
  func.func @transform_2(%arg0: i32, %arg1: i32) -> (i32, i32, i32) {
    %c0_i32 = arith.constant 0 : i32
    %c0_i32_0 = arith.constant 0 : i32
    %c0_i32_1 = arith.constant 0 : i32
    %c0_i32_2 = arith.constant 0 : i32
    return %c0_i32, %c0_i32_0, %c0_i32_1 : i32, i32, i32
  }
  func.func @transform_3(%arg0: i32, %arg1: i32) -> (i32, i32, i32) {
    %c0_i32 = arith.constant 0 : i32
    %c0_i32_0 = arith.constant 0 : i32
    return %arg0, %arg1, %c0_i32 : i32, i32, i32
  }
}

</mosaic_0001>

<bundles_post_ra>
// kernel: _lambda_.3
= control target key start
LH: loop header
LB: loop body
LE: loop exit
PB: predicated region body
PF: predicated region fallthrough
CT: control target
= control target key end

     0   :  { %s619_s15 = smov 0   ;;  %s654_s0 = inlined_call_operand.vmem [shape: f32[2,32,5], index: 0, kind: input, shape index: {}]   ;;  %s655_s1 = inlined_call_operand.vmem [shape: bf16[2,5,128], index: 1, kind: input, shape index: {}]   ;;  %s656_s2 = inlined_call_operand.vmem [shape: f32[1,128], index: 2, kind: input, shape index: {}]   ;;  %s657_s3 = inlined_call_operand.vmem [shape: f32[1,128], index: 3, kind: input, shape index: {}]   ;;  %s658_s4 = inlined_call_operand.vmem [shape: bf16[2,31,128], index: 4, kind: output, shape index: {}]  }
   0x1 LB: > { %s511_s16 = sadd.s32 4294967295, %s591_s15   ;;  %p515_p0 = scmp.ge.s32.totalorder %s591_s15, 1  ;;  %s591_s15 = sphi %s619_s15, %s14_s15  }
   0x2   : > { %p162_p1 = scmp.lt.s32.totalorder %s591_s15, 3 }
   0x4   : > { %p163_p2 = pnand %p515_p0, %p162_p1 }
   0x5   : > { %v520_v0 = vld [vmem:[%s655_s1 + $0x4] sm:$0x7] (!%p163_p2)  ;;  %vm221_vm0 = vcmask (!%p163_p2), 1041408   ;;  %vm222_vm1 = vcmask (!%p163_p2), 1042432   ;;  %p188_p3 = scmp.lt.s32.totalorder (!%p163_p2), %s511_s16, 1  ;;  %v593_v1 = vmov (!%p163_p2), 65535  }
   0x6   : > { %166 = sbr.rel (%p163_p2) target bundleno = 333 (0x14d), region = 36  ;;  %v223_v2 = vsel (!%p163_p2), %vm221_vm0, 4294967295, %v593_v1  ;;  %v205_v3 = vld [vmem:[%s655_s1] sm:$0x7] (!%p163_p2)  ;;  %vm214_vm2 = vcmask (!%p163_p2), 39936   ;;  %vm337_vm3 = vcmask (!%p163_p2), 1046528  }
   0x7   : > { %v224_v4 = vsel (!%p163_p2), %vm222_vm1, %v223_v2, 0  ;;  %v525_v63 = vld [vmem:[%s656_s2] ss:$0 sm:$0xff] (!%p163_p2)  ;;  %vm450_vm4 = vcmask (!%p163_p2), 1043456   ;;  %vm451_vm5 = vsmask.f32 (!%p163_p2), 3328 }
   0x8   : > { %v226_v5 = vand.u32 (!%p163_p2), %v520_v0, %v224_v4  ;;  %v284_v6 = vand.u32 (!%p163_p2), %v224_v4, %v205_v3  ;;  %v526_v4 = vld [vmem:[%s657_s3] ss:$0 sm:$0xff] (!%p163_p2)  ;;  %vm452_vm6 = vmand (!%p163_p2), %vm450_vm4, %vm451_vm5 }
   0xa   : > { %550 = vmatprep.subr.bf16.mxu1 (!%p163_p2), %v226_v5  ;;  %556 = vmatprep.subr.bf16.mxu0 (!%p163_p2), %v284_v6 }
   0xb   : > { %551 = vmatpush3.bf16.msra.mxu1 (!%p163_p2), %v226_v5  ;;  %557 = vmatpush3.bf16.msra.mxu0 (!%p163_p2), %v284_v6 }
   0xd   : > { %s660_s16 = smov (!%p188_p3, %s511_s16), 1 }
   0xe   : > { %s533_s21 = sshll.u32 %s660_s16, 5  ;;  %s534_s29 = sshll.u32 %s660_s16, 4 }
   0xf   : > { %s192_s24 = scalar_lea.vmem %s654_s0, %s533_s21  ;;  %s197_s6 = scalar_lea.vmem %s658_s4, %s534_s29 }
  0x10   : > { %v206_v7 = vld [vmem:[%s192_s24 + $0x1] sm:$0xff]  ;;  %v207_v8 = vld [vmem:[%s192_s24 + $0x9] sm:$0xff]  ;;  %v208_v12 = vld [vmem:[%s192_s24 + $0x11] sm:$0xff] }
  0x11   : > { %v210_v9 = vpack.c.bf16 %v207_v8, %v206_v7  ;;  %v199_v10 = vld [vmem:[%s192_s24] sm:$0xff]  ;;  %v200_v11 = vld [vmem:[%s192_s24 + $0x8] sm:$0xff]  ;;  %v209_v14 = vld [vmem:[%s192_s24 + $0x19] sm:$0x7f] }
  0x12   : > { %v203_v13 = vpack.c.bf16 %v200_v11, %v199_v10  ;;  %v201_v15 = vld [vmem:[%s192_s24 + $0x10] sm:$0xff]  ;;  %v202_v16 = vld [vmem:[%s192_s24 + $0x18] sm:$0x7f]  ;;  %v211_v17 = vpack.c.bf16 %v209_v14, %v208_v12 }
  0x13   : > { %552 = vmatprep.mubr.msk.bf16.mxu1 %vm214_vm2, %v210_v9  ;;  %v204_v18 = vpack.c.bf16 %v202_v16, %v201_v15 }
  0x14   : > { %558 = vmatprep.mubr.msk.bf16.mxu0 %vm214_vm2, %v203_v13  ;;  %553 = vmatmul.mubr.msk.bf16.vlgmr.msra.gmra.mrb[0].mxu1 %vm214_vm2, %v211_v17 }
  0x15   : > { %559 = vmatmul.mubr.msk.bf16.vlgmr.msra.gmra.mrb[0].mxu0 %vm214_vm2, %v204_v18 }
  0xe7   : > { %v554_v19 = vpop.f32.mrb[0].mxu1 }
  0xe8   : > { %v560_v20 = vpop.f32.mrb[0].mxu0  ;;  %v262_v22 = vpop.f32.mrb[1].mxu1 }
  0xe9   : > { %v329_v21 = vadd.f32 %v560_v20, %v554_v19  ;;  %v320_v23 = vpop.f32.mrb[1].mxu0  ;;  %v555_v25 = vpop.f32.mrb[2].mxu1 }
  0xea   : > { %v321_v24 = vadd.f32 %v320_v23, %v262_v22  ;;  %v561_v26 = vpop.f32.mrb[2].mxu0  ;;  %v265_v28 = vpop.f32.mrb[3].mxu1 }
  0xeb   : > { %v332_v27 = vadd.f32 %v561_v26, %v555_v25  ;;  %v323_v29 = vpop.f32.mrb[3].mxu0 }
  0xec   : > { %v324_v30 = vadd.f32 %v323_v29, %v265_v28 }
  0xed   : > { %v338_v33 = vsel %vm337_vm3, %v332_v27, 0.0 }
  0xee   : > { %v335_v31 = vadd.f32 %v324_v30, %v321_v24 }
  0xf0   : > { %v336_v32 = vadd.f32 %v335_v31, %v329_v21 }
  0xf2   : > { %v339_v34 = vadd.f32 %v338_v33, %v336_v32 }
  0xf4   : > { %v340_v35 = vrot.slane %v339_v34, 4 }
  0xf6   : > { %v341_v36 = vadd.f32 %v340_v35, %v339_v34 }
  0xf8   : > { %v342_v37 = vrot.slane %v341_v36, 2 }
  0xfa   : > { %v343_v38 = vadd.f32 %v342_v37, %v341_v36 }
  0xfc   : > { %v344_v39 = vrot.slane %v343_v38, 1 }
  0xfe   : > { %v345_v40 = vadd.f32 %v344_v39, %v343_v38 }
 0x100   : > { %v347_v41 = vmul.f32 0.032258064, %v345_v40 }
 0x102   : > { %v348_v42 = vsub.f32 %v321_v24, %v347_v41  ;;  %v349_v43 = vsub.f32 %v324_v30, %v347_v41  ;;  %v350_v44 = vsub.f32 %v329_v21, %v347_v41  ;;  %v351_v45 = vsub.f32 %v332_v27, %v347_v41 }
 0x104   : > { %v352_v46 = vmul.f32 %v348_v42, %v348_v42  ;;  %v353_v47 = vmul.f32 %v349_v43, %v349_v43  ;;  %v355_v48 = vmul.f32 %v351_v45, %v351_v45  ;;  %v354_v49 = vmul.f32 %v350_v44, %v350_v44 }
 0x106   : > { %v356_v50 = vadd.f32 %v353_v47, %v352_v46  ;;  %v358_v52 = vsel %vm337_vm3, %v355_v48, 0.0 }
 0x108   : > { %v357_v51 = vadd.f32 %v356_v50, %v354_v49  ;;  %v453_v50 = vld [vmem:[%s197_s6 + $0xc] sm:$0xf] }
 0x10a   : > { %v359_v53 = vadd.f32 %v358_v52, %v357_v51 }
 0x10c   : > { %v360_v54 = vrot.slane %v359_v53, 4 }
 0x10e   : > { %v361_v55 = vadd.f32 %v360_v54, %v359_v53 }
 0x110   : > { %v362_v56 = vrot.slane %v361_v55, 2 }
 0x112   : > { %v363_v57 = vadd.f32 %v362_v56, %v361_v55 }
 0x114   : > { %v364_v58 = vrot.slane %v363_v57, 1 }
 0x116   : > { %v365_v59 = vadd.f32 %v364_v58, %v363_v57 }
 0x118   : > { %v366_v60 = vmul.f32 0.032258064, %v365_v59 }
 0x11a   : > { %v367_v61 = vadd.f32 1e-05, %v366_v60 }
 0x11c   : > { %575 = vrsqrt.f32 %v367_v61 }
 0x126   : > { %v576_v62 = vpop.eup %575 }
 0x127   : > { %v369_v0 = vmul.f32 %v576_v62, %v348_v42  ;;  %v370_v1 = vmul.f32 %v576_v62, %v349_v43  ;;  %v371_v2 = vmul.f32 %v576_v62, %v350_v44  ;;  %v372_v3 = vmul.f32 %v576_v62, %v351_v45 }
 0x129   : > { %v380_v5 = vmul.f32 %v525_v63, %v369_v0  ;;  %v381_v6 = vmul.f32 %v525_v63, %v370_v1  ;;  %v382_v7 = vmul.f32 %v525_v63, %v371_v2  ;;  %v383_v8 = vmul.f32 %v525_v63, %v372_v3 }
 0x12b   : > { %v391_v9 = vadd.f32 %v526_v4, %v380_v5  ;;  %v392_v10 = vadd.f32 %v526_v4, %v381_v6  ;;  %v393_v11 = vadd.f32 %v526_v4, %v382_v7  ;;  %v394_v12 = vadd.f32 %v526_v4, %v383_v8 }
 0x12d   : > { %v399_v13 = vmul.f32 0.044715, %v391_v9  ;;  %v400_v14 = vmul.f32 0.044715, %v392_v10  ;;  %v401_v15 = vmul.f32 0.044715, %v393_v11 }
 0x12e   : > { %v402_v16 = vmul.f32 0.044715, %v394_v12  ;;  %v395_v35 = vmul.f32 0.5, %v391_v9  ;;  %v396_v38 = vmul.f32 0.5, %v392_v10  ;;  %v397_v41 = vmul.f32 0.5, %v393_v11 }
 0x12f   : > { %v403_v17 = vmul.f32 %v399_v13, %v391_v9  ;;  %v404_v18 = vmul.f32 %v400_v14, %v392_v10  ;;  %v405_v19 = vmul.f32 %v401_v15, %v393_v11  ;;  %v398_v44 = vmul.f32 0.5, %v394_v12 }
 0x130   : > { %v406_v20 = vmul.f32 %v402_v16, %v394_v12 }
 0x131   : > { %v407_v21 = vmul.f32 %v403_v17, %v391_v9  ;;  %v408_v22 = vmul.f32 %v404_v18, %v392_v10  ;;  %v409_v23 = vmul.f32 %v405_v19, %v393_v11 }
 0x132   : > { %v410_v24 = vmul.f32 %v406_v20, %v394_v12 }
 0x133   : > { %v411_v25 = vadd.f32 %v407_v21, %v391_v9  ;;  %v412_v26 = vadd.f32 %v408_v22, %v392_v10  ;;  %v413_v27 = vadd.f32 %v409_v23, %v393_v11 }
 0x134   : > { %v414_v28 = vadd.f32 %v410_v24, %v394_v12 }
 0x135   : > { %v415_v29 = vmul.f32 0.7978846, %v411_v25  ;;  %v416_v30 = vmul.f32 0.7978846, %v412_v26  ;;  %v417_v31 = vmul.f32 0.7978846, %v413_v27 }
 0x136   : > { %v418_v32 = vmul.f32 0.7978846, %v414_v28 }
 0x137   : > { %577 = vtanh.f32 %v415_v29 }
 0x138   : > { %579 = vtanh.f32 %v416_v30 }
 0x139   : > { %581 = vtanh.f32 %v417_v31 }
 0x13a   : > { %583 = vtanh.f32 %v418_v32 }
 0x141   : > { %v578_v33 = vpop.eup %577 }
 0x142   : > { %v580_v34 = vpop.eup %579  ;;  %v423_v36 = vadd.f32 1.0, %v578_v33 }
 0x143   : > { %v582_v37 = vpop.eup %581  ;;  %v424_v39 = vadd.f32 1.0, %v580_v34 }
 0x144   : > { %v584_v40 = vpop.eup %583  ;;  %v425_v42 = vadd.f32 1.0, %v582_v37  ;;  %v427_v43 = vmul.f32 %v423_v36, %v395_v35 }
 0x145   : > { %v426_v45 = vadd.f32 1.0, %v584_v40  ;;  %v428_v46 = vmul.f32 %v424_v39, %v396_v38 }
 0x146   : > { %v429_v47 = vmul.f32 %v425_v42, %v397_v41 }
 0x147   : > { %v430_v48 = vmul.f32 %v426_v45, %v398_v44  ;;  %v542_v49 = vpack.c.bf16 %v428_v46, %v427_v43 }
 0x148   : > { %v537_v51 = vpack.c.bf16 %v429_v47, %v429_v47 }
 0x149   : > { %v538_v52 = vpack.c.bf16 %v430_v48, %v430_v48  ;;  %543 = vst [vmem:[%s197_s6] sm:$0xff] %v542_v49  }
 0x14a   : > { %449 = vst [vmem:[%s197_s6 + $0x8] sm:$0xf] %v537_v51 }
 0x14b   : > { %v454_v53 = vsel %vm452_vm6, %v538_v52, %v453_v50 }
 0x14c   : > { %455 = vst [vmem:[%s197_s6 + $0xc] sm:$0xf] %v454_v53 }
 0x14d PF: > { %s14_s15 = sadd.s32 1, %s591_s15  }
 0x14e   : > { %p11_p4 = scmp.ge.s32.totalorder %s14_s15, 4  }
 0x150   :  { %13 = sbr.rel (!%p11_p4) target bundleno = 1 (0x1), region = 67 }

// kernel: _lambda_.5
= control target key start
LH: loop header
LB: loop body
LE: loop exit
PB: predicated region body
PF: predicated region fallthrough
CT: control target
= control target key end

     0   :  { %s672_s12 = smov 0   ;;  %s674_s13 = smov 0   ;;  %s757_s0 = inlined_call_operand.vmem [shape: bf16[2,16,256], index: 0, kind: input, shape index: {}, may-alias: {0,1}]   ;;  %s758_s1 = inlined_call_operand.vmem [shape: bf16[2,16,256], index: 1, kind: input, shape index: {}, may-alias: {0,1}]   ;;  %s759_s2 = inlined_call_operand.vmem [shape: bf16[1,256,128], index: 2, kind: input, shape index: {}]   ;;  %s760_s3 = inlined_call_operand.vmem [shape: bf16[2,8,128], index: 3, kind: output, shape index: {}]  }
   0x1   :  { %s676_s14 = smov 0  }
   0x2 LB: > { %s25_s1 = sadd.s32 1, %s646_s13  ;;  %p537_p0 = scmp.ge.s32.totalorder %s650_s14, 1  ;;  %s650_s14 = sphi %s676_s14, %s13_s14   ;;  %s646_s13 = sphi %s674_s13, %s762_s13   ;;  %s642_s12 = sphi %s672_s12, %s761_s12  }
   0x3   : > { %p27_p1 = scmp.ge.s32.totalorder %s25_s1, 2  ;;  %p177_p2 = scmp.lt.s32.totalorder %s650_s14, 3 }
   0x5   : > { %s764_s1 = smov (%p27_p1, %s25_s1), 0  ;;  %p178_p3 = pnand %p537_p0, %p177_p2 }
   0x6   : > { %v608_v0 = vld [vmem:[%s759_s2 + $0x40] sm:$0xff] (!%p178_p3)   ;;  %v610_v2 = vld [vmem:[%s759_s2 + $0x48] sm:$0xff] (!%p178_p3)   ;;  %p217_p4 = scmp.lt.s32.totalorder (!%p178_p3), %s642_s12, 1  ;;  %v612_v4 = vld [vmem:[%s759_s2 + $0x50] sm:$0xff] (!%p178_p3)  }
   0x7   : > { %181 = sbr.rel (%p178_p3) target bundleno = 282 (0x11a), region = 32  ;;  %v609_v1 = vld [vmem:[%s759_s2] sm:$0xff] (!%p178_p3)   ;;  %562 = vmatprep.subr.bf16.mxu0 (!%p178_p3), %v608_v0  ;;  %v611_v3 = vld [vmem:[%s759_s2 + $0x8] sm:$0xff] (!%p178_p3)   ;;  %v613_v5 = vld [vmem:[%s759_s2 + $0x10] sm:$0xff] (!%p178_p3)  }
   0x8   : > { %563 = vmatpush3.bf16.msra.mxu0 (!%p178_p3), %v609_v1  ;;  %v614_v6 = vld [vmem:[%s759_s2 + $0x58] sm:$0xff] (!%p178_p3)   ;;  %v616_v8 = vld [vmem:[%s759_s2 + $0x60] sm:$0xff] (!%p178_p3)   ;;  %v618_v10 = vld [vmem:[%s759_s2 + $0x68] sm:$0xff] (!%p178_p3)  }
   0x9   : > { %564 = vmatprep.subr.bf16.mxu0 (!%p178_p3), %v610_v2  ;;  %v615_v7 = vld [vmem:[%s759_s2 + $0x18] sm:$0xff] (!%p178_p3)   ;;  %v617_v9 = vld [vmem:[%s759_s2 + $0x20] sm:$0xff] (!%p178_p3)   ;;  %v619_v13 = vld [vmem:[%s759_s2 + $0x28] sm:$0xff] (!%p178_p3)  }
   0xa   : > { %v620_v14 = vld [vmem:[%s759_s2 + $0x70] sm:$0xff] (!%p178_p3)   ;;  %v622_v16 = vld [vmem:[%s759_s2 + $0x78] sm:$0xff] (!%p178_p3)  }
   0xb   : > { %v621_v15 = vld [vmem:[%s759_s2 + $0x30] sm:$0xff] (!%p178_p3)   ;;  %v623_v17 = vld [vmem:[%s759_s2 + $0x38] sm:$0xff] (!%p178_p3)  }
   0xc   : > { %565 = vmatpush3.bf16.msra.mxu0 (!%p178_p3), %v611_v3 }
   0xd   : > { %566 = vmatprep.subr.bf16.mxu0 (!%p178_p3), %v612_v4 }
   0xe   : > { %s766_s12 = smov (!%p217_p4, %s642_s12), 1 }
   0xf   : > { %s561_s29 = sshll.u32 %s766_s12, 4  ;;  %s540_s27 = sshll.u32 %s766_s12, 2 }
  0x10   : > { %567 = vmatpush3.bf16.msra.mxu0 %v613_v5  ;;  %s225_s9 = scalar_lea.vmem %s757_s0, %s561_s29  ;;  %s243_s30 = scalar_lea.vmem %s760_s3, %s540_s27 }
  0x11   : > { %568 = vmatprep.subr.bf16.mxu0 %v614_v6  ;;  %v245_v11 = vld [vmem:[%s225_s9] sm:$0xff] }
  0x12   : > { %v542_v12 = vcombine.high %v245_v11, %v245_v11  ;;  %v541_v18 = vcombine.low %v245_v11, %v245_v11 }
  0x14   : > { %569 = vmatpush3.bf16.msra.mxu0 %v615_v7  ;;  %413 = vmatprep.mubr.bf16.mxu0 %v542_v12 }
  0x15   : > { %570 = vmatprep.subr.bf16.mxu0 %v616_v8 }
  0x18   : > { %571 = vmatpush3.bf16.msra.mxu0 %v617_v9 }
  0x19   : > { %572 = vmatprep.subr.bf16.mxu0 %v618_v10 }
  0x1c   : > { %573 = vmatpush3.bf16.msra.mxu0 %v619_v13 }
  0x1d   : > { %574 = vmatprep.subr.bf16.mxu0 %v620_v14 }
  0x20   : > { %575 = vmatpush3.bf16.msra.mxu0 %v621_v15 }
  0x21   : > { %576 = vmatprep.subr.bf16.mxu0 %v622_v16 }
  0x24   : > { %577 = vmatpush3.bf16.msra.mxu0 %v623_v17 }
  0x27   : > { %414 = vmatmul.mubr.bf16.vlgmr.msra.gmra.mrb[0].mxu0 %v541_v18 }
  0xfa   : > { %v578_v19 = vpop.f32.mrb[0].mxu0 }
  0xfb   : > { %v579_v20 = vpop.f32.mrb[1].mxu0 }
  0xfc   : > { %v580_v21 = vadd.f32 %v579_v20, %v578_v19  ;;  %v581_v22 = vpop.f32.mrb[2].mxu0 }
  0xfd   : > { %v582_v23 = vpop.f32.mrb[3].mxu0 }
  0xfe   : > { %v422_v24 = vmul.f32 0.044715, %v580_v21  ;;  %v421_v30 = vmul.f32 0.5, %v580_v21 }
 0x100   : > { %v423_v25 = vmul.f32 %v580_v21, %v422_v24 }
 0x102   : > { %v424_v26 = vmul.f32 %v580_v21, %v423_v25 }
 0x104   : > { %v425_v27 = vadd.f32 %v580_v21, %v424_v26 }
 0x106   : > { %v426_v28 = vmul.f32 0.7978846, %v425_v27 }
 0x108   : > { %626 = vtanh.f32 %v426_v28 }
 0x112   : > { %v627_v29 = vpop.eup %626 }
 0x113   : > { %v428_v31 = vadd.f32 1.0, %v627_v29 }
 0x115   : > { %v429_v32 = vmul.f32 %v428_v31, %v421_v30 }
 0x117   : > { %v430_v33 = vpack.c.bf16 %v429_v32, %v429_v32 }
 0x119   : > { %431 = vst [vmem:[%s243_s30] sm:$0xf] %v430_v33 }
 0x11a PF: > { %s13_s14 = sadd.s32 1, %s650_s14   ;;  %s761_s12 = smov %s646_s13 }
 0x11b   : > { %p10_p5 = scmp.ge.s32.totalorder %s13_s14, 4   ;;  %s762_s13 = smov %s764_s1 }
 0x11d   :  { %12 = sbr.rel (!%p10_p5) target bundleno = 2 (0x2), region = 65 }

// kernel: _lambda_.4
= control target key start
LH: loop header
LB: loop body
LE: loop exit
PB: predicated region body
PF: predicated region fallthrough
CT: control target
= control target key end

     0   :  { %s1327_s12 = smov 0   ;;  %s1329_s13 = smov 0   ;;  %s1515_s0 = inlined_call_operand.vmem [shape: bf16[2,24,256], index: 0, kind: input, shape index: {}, may-alias: {0,1}]   ;;  %s1516_s1 = inlined_call_operand.vmem [shape: bf16[2,24,256], index: 1, kind: input, shape index: {}, may-alias: {0,1}]   ;;  %s1517_s2 = inlined_call_operand.vmem [shape: bf16[2,256,128], index: 2, kind: input, shape index: {}]   ;;  %s1518_s3 = inlined_call_operand.vmem [shape: bf16[2,16,128], index: 3, kind: output, shape index: {}]  }
   0x1   :  { %s1331_s14 = smov 0  }
   0x2 LB: > { %s25_s15 = sadd.s32 1, %s1301_s13  ;;  %p996_p0 = scmp.ge.s32.totalorder %s1305_s14, 1  ;;  %s1305_s14 = sphi %s1331_s14, %s13_s14   ;;  %s1301_s13 = sphi %s1329_s13, %s1520_s13   ;;  %s1297_s12 = sphi %s1327_s12, %s1519_s12  }
   0x3   : > { %p27_p1 = scmp.ge.s32.totalorder %s25_s15, 2  ;;  %p193_p2 = scmp.lt.s32.totalorder %s1305_s14, 3 }
   0x5   : > { %s1522_s15 = smov (%p27_p1, %s25_s15), 0  ;;  %p194_p3 = pnand %p996_p0, %p193_p2 }
   0x6   : > { %v1226_v0 = vld [vmem:[%s1517_s2 + $0x40] sm:$0xff] (!%p194_p3)   ;;  %p248_p4 = scmp.lt.s32.totalorder (!%p194_p3), %s1297_s12, 1  ;;  %v1228_v2 = vld [vmem:[%s1517_s2 + $0x48] sm:$0xff] (!%p194_p3)   ;;  %v1230_v4 = vld [vmem:[%s1517_s2 + $0x50] sm:$0xff] (!%p194_p3)  }
   0x7   : > { %197 = sbr.rel (%p194_p3) target bundleno = 324 (0x144), region = 32  ;;  %v1227_v1 = vld [vmem:[%s1517_s2] sm:$0xff] (!%p194_p3)   ;;  %1133 = vmatprep.subr.bf16.mxu0 (!%p194_p3), %v1226_v0  ;;  %v1229_v3 = vld [vmem:[%s1517_s2 + $0x8] sm:$0xff] (!%p194_p3)   ;;  %v1232_v6 = vld [vmem:[%s1517_s2 + $0x10] sm:$0xff] (!%p194_p3)  }
   0x8   : > { %1134 = vmatpush3.bf16.msra.mxu0 (!%p194_p3), %v1227_v1  ;;  %v1231_v5 = vld [vmem:[%s1517_s2 + $0xc0] sm:$0xff] (!%p194_p3)   ;;  %v1234_v8 = vld [vmem:[%s1517_s2 + $0x58] sm:$0xff] (!%p194_p3)   ;;  %v1235_v9 = vld [vmem:[%s1517_s2 + $0xc8] sm:$0xff] (!%p194_p3)  }
   0x9   : > { %1135 = vmatprep.subr.bf16.mxu0 (!%p194_p3), %v1228_v2  ;;  %1155 = vmatprep.subr.bf16.mxu1 (!%p194_p3), %v1231_v5  ;;  %v1233_v7 = vld [vmem:[%s1517_s2 + $0x80] sm:$0xff] (!%p194_p3)   ;;  %v1236_v10 = vld [vmem:[%s1517_s2 + $0x18] sm:$0xff] (!%p194_p3)   ;;  %v1237_v11 = vld [vmem:[%s1517_s2 + $0x88] sm:$0xff] (!%p194_p3)  }
   0xa   : > { %1156 = vmatpush3.bf16.msra.mxu1 (!%p194_p3), %v1233_v7  ;;  %v1238_v12 = vld [vmem:[%s1517_s2 + $0x60] sm:$0xff] (!%p194_p3)   ;;  %v1239_v13 = vld [vmem:[%s1517_s2 + $0xd0] sm:$0xff] (!%p194_p3)   ;;  %v1242_v16 = vld [vmem:[%s1517_s2 + $0x68] sm:$0xff] (!%p194_p3)  }
   0xb   : > { %1157 = vmatprep.subr.bf16.mxu1 (!%p194_p3), %v1235_v9  ;;  %v1240_v14 = vld [vmem:[%s1517_s2 + $0x20] sm:$0xff] (!%p194_p3)   ;;  %v1241_v15 = vld [vmem:[%s1517_s2 + $0x90] sm:$0xff] (!%p194_p3)   ;;  %v1243_v17 = vld [vmem:[%s1517_s2 + $0xd8] sm:$0xff] (!%p194_p3)  }
   0xc   : > { %1136 = vmatpush3.bf16.msra.mxu0 (!%p194_p3), %v1229_v3  ;;  %v1244_v18 = vld [vmem:[%s1517_s2 + $0x28] sm:$0xff] (!%p194_p3)   ;;  %v1245_v19 = vld [vmem:[%s1517_s2 + $0x98] sm:$0xff] (!%p194_p3)   ;;  %v1246_v20 = vld [vmem:[%s1517_s2 + $0x70] sm:$0xff] (!%p194_p3)  }
   0xd   : > { %1137 = vmatprep.subr.bf16.mxu0 (!%p194_p3), %v1230_v4  ;;  %v1247_v21 = vld [vmem:[%s1517_s2 + $0xe0] sm:$0xff] (!%p194_p3)   ;;  %v1248_v22 = vld [vmem:[%s1517_s2 + $0x30] sm:$0xff] (!%p194_p3)   ;;  %v1250_v24 = vld [vmem:[%s1517_s2 + $0x78] sm:$0xff] (!%p194_p3)  }
   0xe   : > { %s1524_s12 = smov (!%p248_p4, %s1297_s12), 1  ;;  %1158 = vmatpush3.bf16.msra.mxu1 %v1237_v11  ;;  %v1249_v23 = vld [vmem:[%s1517_s2 + $0xa0] sm:$0xff]   ;;  %v1251_v25 = vld [vmem:[%s1517_s2 + $0xe8] sm:$0xff]   ;;  %v1252_v26 = vld [vmem:[%s1517_s2 + $0x38] sm:$0xff]  }
   0xf   : > { %1159 = vmatprep.subr.bf16.mxu1 %v1239_v13  ;;  %s1199_s10 = smul.u32 24, %s1524_s12  ;;  %v1253_v27 = vld [vmem:[%s1517_s2 + $0xa8] sm:$0xff]   ;;  %v1257_v30 = vld [vmem:[%s1517_s2 + $0xf0] sm:$0xff]   ;;  %v1258_v32 = vld [vmem:[%s1517_s2 + $0xc0] sm:$0xff]   ;;  %s1125_s29 = sshll.u32 %s1524_s12, 3 }
  0x10   : > { %1138 = vmatpush3.bf16.msra.mxu0 %v1232_v6  ;;  %v1259_v34 = vld [vmem:[%s1517_s2 + $0xb0] sm:$0xff]   ;;  %v1260_v36 = vld [vmem:[%s1517_s2 + $0x80] sm:$0xff]   ;;  %v1261_v38 = vld [vmem:[%s1517_s2 + $0xf8] sm:$0xff]  }
  0x11   : > { %1139 = vmatprep.subr.bf16.mxu0 %v1234_v8  ;;  %s256_s25 = scalar_lea.vmem %s1515_s0, %s1199_s10  ;;  %v1262_v40 = vld [vmem:[%s1517_s2 + $0xc8] sm:$0xff]   ;;  %v1263_v42 = vld [vmem:[%s1517_s2 + $0xb8] sm:$0xff]   ;;  %v1265_v46 = vld [vmem:[%s1517_s2 + $0xd0] sm:$0xff]   ;;  %s1124_s5 = sadd.s32 16, %s1199_s10 }
  0x12   : > { %1160 = vmatpush3.bf16.msra.mxu1 %v1241_v15  ;;  %v1254_v28 = vld [vmem:[%s256_s25] ss:$8 sps:$4 sm:$0xff]   ;;  %v1256_v29 = vld [vmem:[%s256_s25 + $0x4] ss:$8 sps:$4 sm:$0xff]   ;;  %v1266_v47 = vld [vmem:[%s1517_s2 + $0x90] sm:$0xff]   ;;  %s273_s11 = scalar_lea.vmem %s1516_s1, %s1124_s5  ;;  %s284_s5 = scalar_lea.vmem %s1518_s3, %s1125_s29 }
  0x13   : > { %1161 = vmatprep.subr.bf16.mxu1 %v1243_v17  ;;  %v516_v31 = vshrl.u32 %v1254_v28, 16  ;;  %459 = vmatprep.mubr.bf16.mxu0 %v1256_v29  ;;  %v523_v33 = vshrl.u32 %v1256_v29, 16  ;;  %v525_v35 = vshll.u32 %v1256_v29, 16  ;;  %v518_v37 = vshll.u32 %v1254_v28, 16  ;;  %v1264_v44 = vld [vmem:[%s1517_s2 + $0x88] sm:$0xff]   ;;  %v1267_v48 = vld [vmem:[%s1517_s2 + $0xd8] sm:$0xff]  }
  0x14   : > { %1140 = vmatpush3.bf16.msra.mxu0 %v1236_v10  ;;  %v1268_v49 = vld [vmem:[%s1517_s2 + $0x98] sm:$0xff]   ;;  %v1269_v50 = vld [vmem:[%s1517_s2 + $0xe0] sm:$0xff]   ;;  %v1271_v52 = vld [vmem:[%s1517_s2 + $0xe8] sm:$0xff]  }
  0x15   : > { %1141 = vmatprep.subr.bf16.mxu0 %v1238_v12  ;;  %v527_v39 = vrot.slane %v525_v35, 1  ;;  %v520_v41 = vrot.slane %v518_v37, 1  ;;  %v1270_v51 = vld [vmem:[%s1517_s2 + $0xa0] sm:$0xff]   ;;  %v1272_v55 = vld [vmem:[%s1517_s2 + $0xa8] sm:$0xff]   ;;  %v1273_v56 = vld [vmem:[%s1517_s2 + $0xf0] sm:$0xff]  }
  0x16   : > { %1162 = vmatpush3.bf16.msra.mxu1 %v1245_v19  ;;  %v673_v53 = vld [vmem:[%s273_s11] sm:$0x11]  ;;  %v1274_v57 = vld [vmem:[%s1517_s2 + $0xb0] sm:$0xff]   ;;  %v1275_v58 = vld [vmem:[%s1517_s2 + $0xf8] sm:$0xff]  }
  0x17   : > { %1163 = vmatprep.subr.bf16.mxu1 %v1247_v21  ;;  %v528_v43 = vor.u32 %v527_v39, %v523_v33  ;;  %v521_v45 = vor.u32 %v520_v41, %v516_v31  ;;  %v1102_v54 = vcombine.high %v673_v53, %v673_v53  ;;  %v1276_v59 = vld [vmem:[%s1517_s2 + $0xb8] sm:$0xff]   ;;  %v1101_v60 = vcombine.low %v673_v53, %v673_v53 }
  0x18   : > { %1142 = vmatpush3.bf16.msra.mxu0 %v1240_v14 }
  0x19   : > { %1143 = vmatprep.subr.bf16.mxu0 %v1242_v16  ;;  %659 = vmatprep.mubr.bf16.mxu1 %v528_v43 }
  0x1a   : > { %1164 = vmatpush3.bf16.msra.mxu1 %v1249_v23 }
  0x1b   : > { %1165 = vmatprep.subr.bf16.mxu1 %v1251_v25 }
  0x1c   : > { %1144 = vmatpush3.bf16.msra.mxu0 %v1244_v18 }
  0x1d   : > { %1145 = vmatprep.subr.bf16.mxu0 %v1246_v20 }
  0x1e   : > { %1166 = vmatpush3.bf16.msra.mxu1 %v1253_v27 }
  0x1f   : > { %1167 = vmatprep.subr.bf16.mxu1 %v1257_v30 }
  0x20   : > { %1146 = vmatpush3.bf16.msra.mxu0 %v1248_v22 }
  0x21   : > { %1147 = vmatprep.subr.bf16.mxu0 %v1250_v24 }
  0x22   : > { %1168 = vmatpush3.bf16.msra.mxu1 %v1259_v34 }
  0x23   : > { %1169 = vmatprep.subr.bf16.mxu1 %v1261_v38 }
  0x24   : > { %1148 = vmatpush3.bf16.msra.mxu0 %v1252_v26 }
  0x25   : > { %1177 = vmatprep.subr.bf16.mxu0 %v1258_v32 }
  0x26   : > { %1170 = vmatpush3.bf16.msra.mxu1 %v1263_v42 }
  0x27   : > { %460 = vmatmul.mubr.bf16.vlgmr.msra.gmra.mrb[0].mxu0 %v1254_v28 }
  0x28   : > { %1178 = vmatpush3.bf16.msra.mxu0 %v1260_v36  ;;  %841 = vmatprep.mubr.bf16.mxu0 %v1102_v54 }
  0x29   : > { %1179 = vmatprep.subr.bf16.mxu0 %v1262_v40  ;;  %660 = vmatmul.mubr.bf16.vlgmr.msra.gmra.mrb[0].mxu1 %v521_v45 }
  0x2c   : > { %1180 = vmatpush3.bf16.msra.mxu0 %v1264_v44 }
  0x2d   : > { %1181 = vmatprep.subr.bf16.mxu0 %v1265_v46 }
  0x30   : > { %1182 = vmatpush3.bf16.msra.mxu0 %v1266_v47 }
  0x31   : > { %1183 = vmatprep.subr.bf16.mxu0 %v1267_v48 }
  0x34   : > { %1184 = vmatpush3.bf16.msra.mxu0 %v1268_v49 }
  0x35   : > { %1185 = vmatprep.subr.bf16.mxu0 %v1269_v50 }
  0x38   : > { %1186 = vmatpush3.bf16.msra.mxu0 %v1270_v51 }
  0x39   : > { %1187 = vmatprep.subr.bf16.mxu0 %v1271_v52 }
  0x3c   : > { %1188 = vmatpush3.bf16.msra.mxu0 %v1272_v55 }
  0x3d   : > { %1189 = vmatprep.subr.bf16.mxu0 %v1273_v56 }
  0x40   : > { %1190 = vmatpush3.bf16.msra.mxu0 %v1274_v57 }
  0x41   : > { %1191 = vmatprep.subr.bf16.mxu0 %v1275_v58 }
  0x44   : > { %1192 = vmatpush3.bf16.msra.mxu0 %v1276_v59 }
  0x47   : > { %842 = vmatmul.mubr.bf16.vlgmr.msra.gmra.mrb[4].mxu0 %v1101_v60 }
  0xfa   : > { %v1149_v61 = vpop.f32.mrb[0].mxu0 }
  0xfb   : > { %v1150_v62 = vpop.f32.mrb[1].mxu0 }
  0xfc   : > { %v1151_v63 = vadd.f32 %v1150_v62, %v1149_v61  ;;  %v1152_v0 = vpop.f32.mrb[2].mxu0  ;;  %v1171_v3 = vpop.f32.mrb[0].mxu1 }
  0xfd   : > { %v1153_v1 = vpop.f32.mrb[3].mxu0  ;;  %v1172_v4 = vpop.f32.mrb[1].mxu1 }
  0xfe   : > { %v1154_v2 = vadd.f32 %v1153_v1, %v1152_v0  ;;  %v1173_v5 = vadd.f32 %v1172_v4, %v1171_v3  ;;  %v1174_v6 = vpop.f32.mrb[2].mxu1 }
  0xff   : > { %v1175_v7 = vpop.f32.mrb[3].mxu1 }
 0x100   : > { %469 = vst [vmem:[#allocation2 + $0x8] sm:$0xff] %v1154_v2  ;;  %v668_v8 = vadd.f32 %v1173_v5, %v1151_v63  ;;  %v1176_v9 = vadd.f32 %v1175_v7, %v1174_v6 }
 0x102   : > { %v855_v12 = vmul.f32 0.044715, %v668_v8  ;;  %v853_v33 = vmul.f32 0.5, %v668_v8 }
 0x104   : > { %v857_v19 = vmul.f32 %v855_v12, %v668_v8 }
 0x106   : > { %v859_v21 = vmul.f32 %v857_v19, %v668_v8 }
 0x107   : > { %v471_v10 = vld [vmem:[#allocation2 + $0x8] sm:$0x7f]  ;;  %v672_v17 = vld [vmem:[#allocation2 + $0xf] sm:$0x1] }
 0x108   : > { %v669_v11 = vadd.f32 %v1176_v9, %v471_v10  ;;  %v861_v22 = vadd.f32 %v859_v21, %v668_v8 }
 0x10a   : > { %671 = vst [vmem:[#allocation2 + $0x8] sm:$0x7f] %v669_v11  ;;  %v863_v25 = vmul.f32 0.7978846, %v861_v22 }
 0x10c   : > { %1279 = vtanh.f32 %v863_v25 }
 0x116   : > { %v1280_v30 = vpop.eup %1279 }
 0x117   : > { %v867_v31 = vadd.f32 1.0, %v1280_v30 }
 0x119   : > { %v869_v36 = vmul.f32 %v867_v31, %v853_v33 }
 0x11a   : > { %v1193_v13 = vpop.f32.mrb[4].mxu0 }
 0x11b   : > { %v1194_v14 = vpop.f32.mrb[5].mxu0 }
 0x11c   : > { %v1195_v15 = vadd.f32 %v1194_v14, %v1193_v13  ;;  %v1196_v16 = vpop.f32.mrb[6].mxu0 }
 0x11d   : > { %v1197_v18 = vpop.f32.mrb[7].mxu0 }
 0x11e   : > { %v849_v20 = vadd.f32 %v1195_v15, %v672_v17 }
 0x120   : > { %850 = vst [vmem:[#allocation2 + $0xf] sm:$0x1] %v849_v20 }
 0x127   : > { %v852_v23 = vld [vmem:[#allocation2 + $0x8] sm:$0xff] }
 0x128   : > { %v856_v24 = vmul.f32 0.044715, %v852_v23  ;;  %v854_v34 = vmul.f32 0.5, %v852_v23 }
 0x12a   : > { %v858_v26 = vmul.f32 %v856_v24, %v852_v23 }
 0x12c   : > { %v860_v27 = vmul.f32 %v858_v26, %v852_v23 }
 0x12e   : > { %v862_v28 = vadd.f32 %v860_v27, %v852_v23 }
 0x130   : > { %v864_v29 = vmul.f32 0.7978846, %v862_v28 }
 0x132   : > { %1281 = vtanh.f32 %v864_v29 }
 0x13c   : > { %v1282_v32 = vpop.eup %1281 }
 0x13d   : > { %v868_v35 = vadd.f32 1.0, %v1282_v32 }
 0x13f   : > { %v870_v37 = vmul.f32 %v868_v35, %v854_v34 }
 0x141   : > { %v1131_v38 = vpack.c.bf16 %v870_v37, %v869_v36 }
 0x143   : > { %1132 = vst [vmem:[%s284_s5] sm:$0xff] %v1131_v38  }
 0x144 PF: > { %s13_s14 = sadd.s32 1, %s1305_s14   ;;  %s1519_s12 = smov %s1301_s13 }
 0x145   : > { %p10_p5 = scmp.ge.s32.totalorder %s13_s14, 4   ;;  %s1520_s13 = smov %s1522_s15 }
 0x147   :  { %12 = sbr.rel (!%p10_p5) target bundleno = 2 (0x2), region = 66 }

</bundles_post_ra>
